<compile_context>
chip_gen: v7x
topology: tpu7x:2x2x1
jax: 0.10.0
libtpu: 0.0.40
codegen_flags: <defaults>
</compile_context>

<pallas_src>
import functools

import jax
import jax.numpy as jnp
import numpy as np
from jax.experimental import pallas as pl
from jax.experimental.pallas import tpu as pltpu


# ---------------- configuration (mirrors AtomEncoder.__init__) -----------------
EMB_DIM = 32
FEATURE_DIMS = ([5, 7, 3], 4)      # (categorical vocab sizes, num scalar feats)
SIGMA_EMBED_DIM = 2
NUM_CAT = len(FEATURE_DIMS[0])                      # 3
NUM_SCALAR = FEATURE_DIMS[1] + SIGMA_EMBED_DIM      # 6
F_TOTAL = NUM_CAT + NUM_SCALAR                      # 9
VOCAB_TOTAL = int(np.sum(FEATURE_DIMS[0]))          # 15
OFFSETS = tuple(int(o) for o in np.cumsum([0] + FEATURE_DIMS[0][:-1]))  # (0, 5, 12)
K_FEAT = VOCAB_TOTAL + NUM_SCALAR + 1               # 22 = onehot | scalars | bias-one


# ------------------------------- Pallas kernel ---------------------------------
def atom_encoder_kernel(idx_ref, base_ref, w_ref, o_ref, *, num_idx, k_packed):
    """One fused matmul per tile.

    idx_ref : [TR, num_idx] int32  -- global one-hot column per (node-slot, cat feat)
    base_ref: [TR, k_packed] f32   -- scalar feats + bias-one, zeros at one-hot slots
    w_ref   : [k_packed, 128] f32  -- block-diagonal fused [emb; W; b] weight
    o_ref   : [TR, 128] f32        -- PACK nodes' embeddings per row (lane-dense)
    """
    idx = idx_ref[...]
    base = base_ref[...]
    tr = base.shape[0]

    iota = jax.lax.broadcasted_iota(jnp.int32, (tr, k_packed), 1)
    # Multi-hot built in int32, no zeros-init: start from the first compare.
    oh = (iota == idx[:, 0:1]).astype(jnp.int32)
    for c in range(1, num_idx):                      # static unroll (num_idx = 12)
        oh = oh + (iota == idx[:, c:c + 1]).astype(jnp.int32)

    act = base + oh.astype(jnp.float32)              # [TR, k_packed]
    o_ref[...] = jnp.dot(act, w_ref[...], preferred_element_type=jnp.float32)


# --------------------------------- wrapper --------------------------------------
def atom_encoder(x, emb_table, w, b, *, block_rows=512):
    """x: [N, F_TOTAL] float32 (categorical columns hold integer-valued floats).

    Returns [N, emb_dim] float32.  `block_rows` is the packed-row tile; each packed
    row holds PACK = 128 // emb_dim nodes (512 packed rows == 2048 nodes per tile).
    """
    n, f = x.shape
    assert f == F_TOTAL
    emb_dim = emb_table.shape[1]
    assert 128 % emb_dim == 0, "lane-dense packing assumes emb_dim divides 128"
    pack = 128 // emb_dim                          # 4 nodes per output row
    k_packed = pack * K_FEAT                       # 88
    num_idx = pack * NUM_CAT                       # 12
    out_lanes = pack * emb_dim                     # 128

    # ---- split / cast / offset the input outside the kernel (fuses with the load) ----
    cat = x[:, :NUM_CAT].astype(jnp.int32)                          # [N, 3]
    # Clamp per feature so an out-of-range index can't bleed into the next table.
    hi = jnp.asarray([d - 1 for d in FEATURE_DIMS[0]], jnp.int32)
    cat = jnp.clip(cat, 0, hi[None, :])
    scal = x[:, NUM_CAT:NUM_CAT + NUM_SCALAR].astype(jnp.float32)   # [N, 6]

    # Pad N so that the packed row count is a multiple of the tile (and of 8).
    r = -(-n // pack)
    tr = max(8, (min(block_rows, -(-r // 8) * 8) // 8) * 8)
    r_pad = -(-r // tr) * tr
    n_pad = r_pad * pack
    if n_pad != n:
        cat = jnp.pad(cat, ((0, n_pad - n), (0, 0)))
        scal = jnp.pad(scal, ((0, n_pad - n), (0, 0)))

    # Global one-hot column = node-slot offset + per-feature vocab offset + value.
    slot = (jnp.arange(n_pad, dtype=jnp.int32) % pack) * K_FEAT             # [n_pad]
    idx_node = cat + jnp.asarray(OFFSETS, jnp.int32)[None, :] + slot[:, None]
    idx_packed = idx_node.reshape(r_pad, num_idx)                           # [R, 12]

    # Activation base: zeros at one-hot slots, then scalar feats, then 1 (bias).
    base_node = jnp.concatenate(
        [jnp.zeros((n_pad, VOCAB_TOTAL), jnp.float32),
         scal,
         jnp.ones((n_pad, 1), jnp.float32)], axis=1)                        # [n_pad, 22]
    base_packed = base_node.reshape(r_pad, k_packed)                        # [R, 88]

    # Fused weight [emb_tables; W; b], replicated block-diagonally for the packing.
    w_node = jnp.concatenate(
        [emb_table.astype(jnp.float32),
         w.astype(jnp.float32),
         b.reshape(1, emb_dim).astype(jnp.float32)], axis=0)                # [22, 32]
    w_big = jnp.zeros((k_packed, out_lanes), jnp.float32)
    for j in range(pack):
        w_big = w_big.at[j * K_FEAT:(j + 1) * K_FEAT,
                         j * emb_dim:(j + 1) * emb_dim].set(w_node)         # [88, 128]

    kernel = functools.partial(atom_encoder_kernel, num_idx=num_idx, k_packed=k_packed)

    out_packed = pl.pallas_call(
        kernel,
        out_shape=jax.ShapeDtypeStruct((r_pad, out_lanes), jnp.float32),
        grid_spec=pltpu.PrefetchScalarGridSpec(
            num_scalar_prefetch=0,
            grid=(r_pad // tr,),
            in_specs=[
                pl.BlockSpec((tr, num_idx), lambda i: (i, 0)),          # packed indices
                pl.BlockSpec((tr, k_packed), lambda i: (i, 0)),         # packed base
                pl.BlockSpec((k_packed, out_lanes), lambda i: (0, 0)),  # fused weight
            ],
            out_specs=pl.BlockSpec((tr, out_lanes), lambda i: (i, 0)),
        ),
        # "parallel": lets v7x shard the row grid over its 2 TCs; harmless on v5e/v6e.
        compiler_params=pltpu.CompilerParams(dimension_semantics=("parallel",)),
    )(idx_packed, base_packed, w_big)

    # [R, 128] is a bit-identical row-major view of [n_pad, 32]; the reshape is free.
    return out_packed.reshape(n_pad, emb_dim)[:n]


# --------------------------- pure-JAX reference --------------------------------
def atom_encoder_ref(x, emb_table, w, b):
    out = jnp.zeros((x.shape[0], emb_table.shape[1]), jnp.float32)
    for i in range(NUM_CAT):
        idx = x[:, i].astype(jnp.int32) + OFFSETS[i]
        out = out + emb_table[idx]
    scal = x[:, NUM_CAT:NUM_CAT + NUM_SCALAR]
    out = out + scal @ w + b
    return out


# ------------------------------------ main --------------------------------------
if __name__ == "__main__":
    key = jax.random.PRNGKey(0)
    k_emb, k_w, k_b, k_cat, k_scal = jax.random.split(key, 5)

    N = 16

    # Deterministic parameter init (xavier-uniform for embeddings, uniform for Linear).
    emb_tables = []
    subkeys = jax.random.split(k_emb, NUM_CAT)
    for i, dim in enumerate(FEATURE_DIMS[0]):
        bound = float(np.sqrt(6.0 / (dim + EMB_DIM)))
        emb_tables.append(
            jax.random.uniform(subkeys[i], (dim, EMB_DIM), jnp.float32, -bound, bound))
    emb_table = jnp.concatenate(emb_tables, axis=0)                  # [VOCAB_TOTAL, emb_dim]

    lin_bound = float(1.0 / np.sqrt(NUM_SCALAR))
    w = jax.random.uniform(k_w, (NUM_SCALAR, EMB_DIM), jnp.float32, -lin_bound, lin_bound)
    b = jax.random.uniform(k_b, (1, EMB_DIM), jnp.float32, -lin_bound, lin_bound)

    # Input: categorical columns are integer-valued floats, scalar columns are floats.
    cat_cols = []
    cat_keys = jax.random.split(k_cat, NUM_CAT)
    for i, dim in enumerate(FEATURE_DIMS[0]):
        cat_cols.append(
            jax.random.randint(cat_keys[i], (N, 1), 0, dim).astype(jnp.float32))
    scal_cols = jax.random.normal(k_scal, (N, NUM_SCALAR), jnp.float32)
    x = jnp.concatenate(cat_cols + [scal_cols], axis=1)              # [N, F_TOTAL]

    out = atom_encoder(x, emb_table, w, b)
    out = jax.block_until_ready(out)

    ref = atom_encoder_ref(x, emb_table, w, b)
    np.testing.assert_allclose(np.asarray(out), np.asarray(ref), rtol=1e-5, atol=1e-5)

    print("KERNEL_OK")
</pallas_src>

<mosaic_0001>
module attributes {stable_mosaic.version = 11 : i64} {
  func.func @atom_encoder_kernel(%arg0: i32, %arg1: memref<8x12xi32, #tpu.memory_space<vmem>>, %arg2: memref<8x88xf32, #tpu.memory_space<vmem>>, %arg3: memref<88x128xf32, #tpu.memory_space<vmem>>, %arg4: memref<8x128xf32, #tpu.memory_space<vmem>>) attributes {dimension_semantics = [#tpu.dimension_semantics<parallel>], iteration_bounds = array<i64: 1>, scalar_prefetch = 0 : i64, scratch_operands = 0 : i64, tpu.core_type = #tpu.core_type<tc>, window_params = [{transform_indices = @transform_0, window_bounds = array<i64: 8, 12>}, {transform_indices = @transform_1, window_bounds = array<i64: 8, 88>}, {pipeline_mode = #tpu.pipeline_mode<synchronous>, transform_indices = @transform_2, window_bounds = array<i64: 88, 128>}, {transform_indices = @transform_3, window_bounds = array<i64: 8, 128>}]} {
    %c0 = arith.constant 0 : index
    %c0_0 = arith.constant 0 : index
    %0 = vector.load %arg1[%c0, %c0_0] : memref<8x12xi32, #tpu.memory_space<vmem>>, vector<8x12xi32>
    %c0_1 = arith.constant 0 : index
    %c0_2 = arith.constant 0 : index
    %1 = vector.load %arg2[%c0_1, %c0_2] : memref<8x88xf32, #tpu.memory_space<vmem>>, vector<8x88xf32>
    %2 = tpu.iota {dimensions = array<i32: 1>} : vector<8x88xi32>
    %3 = vector.extract_strided_slice %0 {offsets = [0, 0], sizes = [8, 1], strides = [1, 1]} : vector<8x12xi32> to vector<8x1xi32>
    %4 = vector.broadcast %3 : vector<8x1xi32> to vector<8x88xi32>
    %5 = arith.cmpi eq, %2, %4 : vector<8x88xi32>
    %6 = arith.extui %5 : vector<8x88xi1> to vector<8x88xi32>
    %7 = vector.extract_strided_slice %0 {offsets = [0, 1], sizes = [8, 1], strides = [1, 1]} : vector<8x12xi32> to vector<8x1xi32>
    %8 = vector.broadcast %7 : vector<8x1xi32> to vector<8x88xi32>
    %9 = arith.cmpi eq, %2, %8 : vector<8x88xi32>
    %10 = arith.extui %9 : vector<8x88xi1> to vector<8x88xi32>
    %11 = arith.addi %6, %10 : vector<8x88xi32>
    %12 = vector.extract_strided_slice %0 {offsets = [0, 2], sizes = [8, 1], strides = [1, 1]} : vector<8x12xi32> to vector<8x1xi32>
    %13 = vector.broadcast %12 : vector<8x1xi32> to vector<8x88xi32>
    %14 = arith.cmpi eq, %2, %13 : vector<8x88xi32>
    %15 = arith.extui %14 : vector<8x88xi1> to vector<8x88xi32>
    %16 = arith.addi %11, %15 : vector<8x88xi32>
    %17 = vector.extract_strided_slice %0 {offsets = [0, 3], sizes = [8, 1], strides = [1, 1]} : vector<8x12xi32> to vector<8x1xi32>
    %18 = vector.broadcast %17 : vector<8x1xi32> to vector<8x88xi32>
    %19 = arith.cmpi eq, %2, %18 : vector<8x88xi32>
    %20 = arith.extui %19 : vector<8x88xi1> to vector<8x88xi32>
    %21 = arith.addi %16, %20 : vector<8x88xi32>
    %22 = vector.extract_strided_slice %0 {offsets = [0, 4], sizes = [8, 1], strides = [1, 1]} : vector<8x12xi32> to vector<8x1xi32>
    %23 = vector.broadcast %22 : vector<8x1xi32> to vector<8x88xi32>
    %24 = arith.cmpi eq, %2, %23 : vector<8x88xi32>
    %25 = arith.extui %24 : vector<8x88xi1> to vector<8x88xi32>
    %26 = arith.addi %21, %25 : vector<8x88xi32>
    %27 = vector.extract_strided_slice %0 {offsets = [0, 5], sizes = [8, 1], strides = [1, 1]} : vector<8x12xi32> to vector<8x1xi32>
    %28 = vector.broadcast %27 : vector<8x1xi32> to vector<8x88xi32>
    %29 = arith.cmpi eq, %2, %28 : vector<8x88xi32>
    %30 = arith.extui %29 : vector<8x88xi1> to vector<8x88xi32>
    %31 = arith.addi %26, %30 : vector<8x88xi32>
    %32 = vector.extract_strided_slice %0 {offsets = [0, 6], sizes = [8, 1], strides = [1, 1]} : vector<8x12xi32> to vector<8x1xi32>
    %33 = vector.broadcast %32 : vector<8x1xi32> to vector<8x88xi32>
    %34 = arith.cmpi eq, %2, %33 : vector<8x88xi32>
    %35 = arith.extui %34 : vector<8x88xi1> to vector<8x88xi32>
    %36 = arith.addi %31, %35 : vector<8x88xi32>
    %37 = vector.extract_strided_slice %0 {offsets = [0, 7], sizes = [8, 1], strides = [1, 1]} : vector<8x12xi32> to vector<8x1xi32>
    %38 = vector.broadcast %37 : vector<8x1xi32> to vector<8x88xi32>
    %39 = arith.cmpi eq, %2, %38 : vector<8x88xi32>
    %40 = arith.extui %39 : vector<8x88xi1> to vector<8x88xi32>
    %41 = arith.addi %36, %40 : vector<8x88xi32>
    %42 = vector.extract_strided_slice %0 {offsets = [0, 8], sizes = [8, 1], strides = [1, 1]} : vector<8x12xi32> to vector<8x1xi32>
    %43 = vector.broadcast %42 : vector<8x1xi32> to vector<8x88xi32>
    %44 = arith.cmpi eq, %2, %43 : vector<8x88xi32>
    %45 = arith.extui %44 : vector<8x88xi1> to vector<8x88xi32>
    %46 = arith.addi %41, %45 : vector<8x88xi32>
    %47 = vector.extract_strided_slice %0 {offsets = [0, 9], sizes = [8, 1], strides = [1, 1]} : vector<8x12xi32> to vector<8x1xi32>
    %48 = vector.broadcast %47 : vector<8x1xi32> to vector<8x88xi32>
    %49 = arith.cmpi eq, %2, %48 : vector<8x88xi32>
    %50 = arith.extui %49 : vector<8x88xi1> to vector<8x88xi32>
    %51 = arith.addi %46, %50 : vector<8x88xi32>
    %52 = vector.extract_strided_slice %0 {offsets = [0, 10], sizes = [8, 1], strides = [1, 1]} : vector<8x12xi32> to vector<8x1xi32>
    %53 = vector.broadcast %52 : vector<8x1xi32> to vector<8x88xi32>
    %54 = arith.cmpi eq, %2, %53 : vector<8x88xi32>
    %55 = arith.extui %54 : vector<8x88xi1> to vector<8x88xi32>
    %56 = arith.addi %51, %55 : vector<8x88xi32>
    %57 = vector.extract_strided_slice %0 {offsets = [0, 11], sizes = [8, 1], strides = [1, 1]} : vector<8x12xi32> to vector<8x1xi32>
    %58 = vector.broadcast %57 : vector<8x1xi32> to vector<8x88xi32>
    %59 = arith.cmpi eq, %2, %58 : vector<8x88xi32>
    %60 = arith.extui %59 : vector<8x88xi1> to vector<8x88xi32>
    %61 = arith.addi %56, %60 : vector<8x88xi32>
    %62 = arith.sitofp %61 : vector<8x88xi32> to vector<8x88xf32>
    %63 = arith.addf %1, %62 : vector<8x88xf32>
    %c0_3 = arith.constant 0 : index
    %c0_4 = arith.constant 0 : index
    %64 = vector.load %arg3[%c0_3, %c0_4] : memref<88x128xf32, #tpu.memory_space<vmem>>, vector<88x128xf32>
    %cst = arith.constant dense<0.000000e+00> : vector<8x128xf32>
    %65 = tpu.matmul %63, %64, %cst {dimension_numbers = #tpu.dot_dimension_numbers<[1], [0], [0], [1], [0, 0, 1, 1], [], []>} : vector<8x88xf32>, vector<88x128xf32>, vector<8x128xf32> -> vector<8x128xf32>
    %c0_5 = arith.constant 0 : index
    %c0_6 = arith.constant 0 : index
    %66 = vector.load %arg4[%c0_5, %c0_6] : memref<8x128xf32, #tpu.memory_space<vmem>>, vector<8x128xf32>
    tpu.vector_store %arg4[%c0_5, %c0_6], %65 {strides = array<i32>} : memref<8x128xf32, #tpu.memory_space<vmem>>, vector<8x128xf32>,
    return
  }
  func.func @transform_0(%arg0: i32) -> (i32, i32) {
    %c0_i32 = arith.constant 0 : i32
    %c0_i32_0 = arith.constant 0 : i32
    return %arg0, %c0_i32 : i32, i32
  }
  func.func @transform_1(%arg0: i32) -> (i32, i32) {
    %c0_i32 = arith.constant 0 : i32
    %c0_i32_0 = arith.constant 0 : i32
    return %arg0, %c0_i32 : i32, i32
  }
  func.func @transform_2(%arg0: i32) -> (i32, i32) {
    %c0_i32 = arith.constant 0 : i32
    %c0_i32_0 = arith.constant 0 : i32
    %c0_i32_1 = arith.constant 0 : i32
    return %c0_i32, %c0_i32_0 : i32, i32
  }
  func.func @transform_3(%arg0: i32) -> (i32, i32) {
    %c0_i32 = arith.constant 0 : i32
    %c0_i32_0 = arith.constant 0 : i32
    return %arg0, %c0_i32 : i32, i32
  }
}

</mosaic_0001>

<bundles_post_ra>
// kernel: tpu_custom_call.1
= control target key start
LH: loop header
LB: loop body
LE: loop exit
PB: predicated region body
PF: predicated region fallthrough
CT: control target
= control target key end

     0   :  { %8 = vsyncpa [#allocation3], 0  ;;  %s513_s0 = inlined_call_operand.hbm [shape: s32[8,12], index: 0, kind: input, shape index: {}]   ;;  %s514_s1 = inlined_call_operand.hbm [shape: f32[8,88], index: 1, kind: input, shape index: {}]   ;;  %s515_s2 = inlined_call_operand.hbm [shape: f32[88,128], index: 2, kind: input, shape index: {}]   ;;  %s516_s3 = inlined_call_operand.hbm [shape: f32[8,128], index: 3, kind: output, shape index: {}]  }
   0x1   :  { %9 = vsyncpa [#allocation6], 0 }
   0x2   :  { %10 = vsyncpa [#allocation4], 0  ;;  %s411_s12 = smov [#allocation5]   ;;  %s412_s14 = smov [#allocation2]  }
   0x3   :  { %s27_s13 = sshll.u32 %s411_s12, 4  ;;  %s17_s15 = sshll.u32 %s412_s14, 4  ;;  %s28_s13 = int_to_ptr.vmem [resolvable:$true] %s27_s13  ;;  %s18_s15 = int_to_ptr.vmem [resolvable:$true] %s17_s15 }
   0x4   :  { %s317_s18 = scalar_lea.hbm %s514_s1, 128 }
   0x5   :  { %p318_p0 = scmp.ne.s32.totalorder %s514_s1, %s317_s18  ;;  %p321_p1 = scmp.lt.u32.totalorder %s317_s18, %s514_s1 }
   0x7   :  { %p323_p2 = pnand %p321_p1, %p318_p0 }
   0x9   :  { %326 = shalt.err (!%p323_p2)
}
   0xa   :  { %s327_s23 = scalar_lea.vmem %s28_s13, 128  ;;  %p332_p4 = scmp.lt.s32.totalorder %s28_s13, %s28_s13 }
   0xb   :  { %p328_p3 = scmp.ne.s32.totalorder %s28_s13, %s327_s23  ;;  %p333_p5 = scmp.lt.s32.totalorder %s327_s23, %s327_s23 }
   0xd   :  { %p334_p6 = por %p333_p5, %p332_p4 }
   0xf   :  { %p335_p7 = pnand %p334_p6, %p328_p3 }
  0x11   :  { %338 = shalt.err (!%p335_p7)
}
  0x12   :  { %30 = dma.hbm_to_vmem [thread:$0]  %s514_s1, 128, %s28_s13, [#allocation6]  }
  0x13   :  { %s339_s28 = scalar_lea.hbm %s513_s0, 128 }
  0x14   :  { %p340_p8 = scmp.ne.s32.totalorder %s513_s0, %s339_s28  ;;  %p343_p9 = scmp.lt.u32.totalorder %s339_s28, %s513_s0 }
  0x16   :  { %p345_p10 = pnand %p343_p9, %p340_p8 }
  0x18   :  { %348 = shalt.err (!%p345_p10)
}
  0x19   :  { %s349_s6 = scalar_lea.vmem %s18_s15, 128  ;;  %p354_p12 = scmp.lt.s32.totalorder %s18_s15, %s18_s15 }
  0x1a   :  { %p350_p11 = scmp.ne.s32.totalorder %s18_s15, %s349_s6  ;;  %p355_p13 = scmp.lt.s32.totalorder %s349_s6, %s349_s6 }
  0x1c   :  { %p356_p0 = por %p355_p13, %p354_p12 }
  0x1e   :  { %p357_p1 = pnand %p356_p0, %p350_p11 }
  0x20   :  { %360 = shalt.err (!%p357_p1)
}
  0x21   :  { %20 = dma.hbm_to_vmem [thread:$0]  %s513_s0, 128, %s18_s15, [#allocation3]  }
  0x22   :  { %s413_s8 = smov [#allocation7]   ;;  %s361_s12 = scalar_lea.hbm %s515_s2, 1408 }
  0x23   :  { %s36_s9 = sshll.u32 %s413_s8, 4  ;;  %p362_p2 = scmp.ne.s32.totalorder %s515_s2, %s361_s12  ;;  %s37_s9 = int_to_ptr.vmem [resolvable:$true] %s36_s9 }
  0x24   :  { %p365_p3 = scmp.lt.u32.totalorder %s361_s12, %s515_s2 }
  0x26   :  { %p367_p4 = pnand %p365_p3, %p362_p2 }
  0x28   :  { %370 = shalt.err (!%p367_p4)
}
  0x29   :  { %s371_s18 = scalar_lea.vmem %s37_s9, 1408  ;;  %p376_p6 = scmp.lt.s32.totalorder %s37_s9, %s37_s9 }
  0x2a   :  { %p372_p5 = scmp.ne.s32.totalorder %s37_s9, %s371_s18  ;;  %p377_p7 = scmp.lt.s32.totalorder %s371_s18, %s371_s18 }
  0x2c   :  { %p378_p8 = por %p377_p7, %p376_p6 }
  0x2e   :  { %p379_p9 = pnand %p378_p8, %p372_p5 }
  0x30   :  { %382 = shalt.err (!%p379_p9)
}
  0x31   :  { %s414_s0 = smov 128   ;;  %s415_s15 = smov 8  }
  0x32   :  { %42 = dma.hbm_to_vmem [thread:$0]  %s515_s2, 1408, %s37_s9, [#allocation6], %s414_s0, %s414_s0, %s415_s15  }
  0x33   :  { %405 = dma.done.wait [#allocation3], 128  }
  0x34   :  { %406 = vsyncadd [#allocation3], 4294967168 }
  0x35   :  { %407 = dma.done.wait [#allocation6], 1536  }
  0x36   :  { %408 = vsyncadd [#allocation6], 4294965760  ;;  %v416_v0 = vmov 2   ;;  %v417_v1 = vmov 0   ;;  %v52_v2 = vld [vmem:[#allocation2] sm:$0xff]  ;;  %v418_v3 = vmov 3   ;;  %v54_v31 = vlaneseq }
  0x37   :  { %307 = vset.pattern.permute.xlu1 %v416_v0  ;;  %305 = vset.pattern.permute.xlu0 %v417_v1  ;;  %v419_v4 = vmov 1   ;;  %v420_v5 = vmov 4   ;;  %v421_v6 = vmov 5   ;;  %v422_v7 = vmov 6   ;;  %v129_v9 = vld [vmem:[#allocation7] sm:$0xff]  ;;  %v130_v10 = vld [vmem:[#allocation7 + $0x8] sm:$0xff] }
  0x38   :  { %68 = vperm.xlu1 %307, %v52_v2   ;;  %57 = vperm.xlu0 %305, %v52_v2   ;;  %v423_v8 = vmov 8   ;;  %v270_v11 = vpack.c.bf16 %v130_v10, %v129_v9  ;;  %v424_v12 = vmov 0.0|0.0   ;;  %v425_v13 = vmov 7   ;;  %v131_v15 = vld [vmem:[#allocation7 + $0x10] sm:$0xff]  ;;  %v132_v16 = vld [vmem:[#allocation7 + $0x18] sm:$0xff]  ;;  %v133_v19 = vld [vmem:[#allocation7 + $0x20] sm:$0xff] }
  0x39   :  { %269 = vmatprep.subr.bf16.mxu0 %v424_v12  ;;  %v426_v14 = vmov 11   ;;  %v273_v17 = vpack.c.bf16 %v132_v16, %v131_v15  ;;  %v427_v18 = vmov 9   ;;  %v134_v20 = vld [vmem:[#allocation7 + $0x28] sm:$0xff]  ;;  %v135_v22 = vld [vmem:[#allocation7 + $0x30] sm:$0xff]  ;;  %v136_v23 = vld [vmem:[#allocation7 + $0x38] sm:$0xff]  ;;  %v428_v24 = vmov 10  }
  0x3a   :  { %271 = vmatpush3.bf16.msra.mxu0 %v270_v11  ;;  %v276_v21 = vpack.c.bf16 %v134_v20, %v133_v19  ;;  %v279_v25 = vpack.c.bf16 %v136_v23, %v135_v22  ;;  %v137_v26 = vld [vmem:[#allocation7 + $0x40] sm:$0xff]  ;;  %v138_v27 = vld [vmem:[#allocation7 + $0x48] sm:$0xff]  ;;  %v429_v29 = vmov 0.0   ;;  %v139_v30 = vld [vmem:[#allocation7 + $0x50] sm:$0xff]  ;;  %vm430_vm0 = vmmov 0   ;;  %s431_s2 = smov [#allocation8]  }
  0x3b   :  { %272 = vmatprep.subr.bf16.mxu0 %v424_v12  ;;  %v282_v28 = vpack.c.bf16 %v138_v27, %v137_v26  ;;  %266 = vmatprep.mubr.msk.f32.mxu0 %vm430_vm0, %v429_v29  ;;  %v55_v32 = vand.u32 127, %v54_v31  ;;  %vm140_vm13 = vcmask 719872   ;;  %s221_s21 = sshll.u32 %s431_s2, 4  ;;  %s222_s21 = int_to_ptr.vmem [resolvable:$true] %s221_s21 }
  0x3c   :  { %308 = vset.pattern.permute.xlu1 %v418_v3  ;;  %306 = vset.pattern.permute.xlu0 %v419_v4  ;;  %s383_s22 = scalar_lea.vmem %s222_s21, 128  ;;  %p388_p11 = scmp.lt.s32.totalorder %s222_s21, %s222_s21 }
  0x3d   :  { %74 = vperm.xlu1 %308, %v52_v2   ;;  %62 = vperm.xlu0 %306, %v52_v2   ;;  %p384_p10 = scmp.ne.s32.totalorder %s222_s21, %s383_s22  ;;  %p389_p12 = scmp.lt.s32.totalorder %s383_s22, %s383_s22 }
  0x3e   :  { %274 = vmatpush3.bf16.msra.mxu0 %v273_v17 }
  0x3f   :  { %275 = vmatprep.subr.bf16.mxu0 %v424_v12  ;;  %p390_p13 = por %p389_p12, %p388_p11 }
  0x41   :  { %309 = vset.pattern.permute.xlu1 %v420_v5  ;;  %310 = vset.pattern.permute.xlu0 %v421_v6  ;;  %v53_v5 = vld [vmem:[#allocation5] sm:$0xff]  ;;  %p391_p0 = pnand %p390_p13, %p384_p10 }
  0x42   :  { %80 = vperm.xlu1 %309, %v52_v2   ;;  %86 = vperm.xlu0 %310, %v52_v2  }
  0x43   :  { %277 = vmatpush3.bf16.msra.mxu0 %v276_v21 }
  0x44   :  { %278 = vmatprep.subr.bf16.mxu0 %v424_v12 }
  0x46   :  { %311 = vset.pattern.permute.xlu1 %v422_v7  ;;  %313 = vset.pattern.permute.xlu0 %v423_v8 }
  0x47   :  { %92 = vperm.xlu1 %311, %v52_v2   ;;  %104 = vperm.xlu0 %313, %v52_v2  }
  0x48   :  { %280 = vmatpush3.bf16.msra.mxu0 %v279_v25 }
  0x49   :  { %281 = vmatprep.subr.bf16.mxu0 %v424_v12 }
  0x4b   :  { %312 = vset.pattern.permute.xlu1 %v425_v13  ;;  %316 = vset.pattern.permute.xlu0 %v426_v14 }
  0x4c   :  { %98 = vperm.xlu1 %312, %v52_v2   ;;  %122 = vperm.xlu0 %316, %v52_v2  }
  0x4d   :  { %283 = vmatpush3.bf16.msra.mxu0 %v282_v28 }
  0x4e   :  { %264 = vmatprep.subr.mxu0 %v429_v29 }
  0x50   :  { %314 = vset.pattern.permute.xlu1 %v427_v18 }
  0x51   :  { %110 = vperm.xlu1 %314, %v52_v2   ;;  %265 = vmatpush3.msra.mxu0 %v139_v30 }
  0x55   :  { %315 = vset.pattern.permute.xlu1 %v428_v24 }
  0x56   :  { %116 = vperm.xlu1 %315, %v52_v2  }
  0xb7   :  { %v69_v33 = vpop.permute.xlu1 %68  ;;  %v58_v34 = vpop.permute.xlu0 %57 }
  0xb8   :  { %vm59_vm1 = vcmp.eq.s32.totalorder %v55_v32, %v58_v34  ;;  %vm70_vm2 = vcmp.eq.s32.totalorder %v55_v32, %v69_v33 }
  0xb9   :  { %v60_v35 = vsel %vm59_vm1, 1, %v417_v1  ;;  %v71_v40 = vsel %vm70_vm2, 1, %v417_v1 }
  0xbc   :  { %v75_v36 = vpop.permute.xlu1 %74  ;;  %v63_v37 = vpop.permute.xlu0 %62 }
  0xbd   :  { %vm64_vm3 = vcmp.eq.s32.totalorder %v55_v32, %v63_v37  ;;  %vm76_vm4 = vcmp.eq.s32.totalorder %v55_v32, %v75_v36 }
  0xbe   :  { %v65_v38 = vsel %vm64_vm3, 1, %v417_v1  ;;  %v77_v44 = vsel %vm76_vm4, 1, %v417_v1 }
  0xbf   :  { %v66_v39 = vadd.s32 %v65_v38, %v60_v35 }
  0xc1   :  { %v72_v41 = vadd.s32 %v71_v40, %v66_v39  ;;  %v81_v42 = vpop.permute.xlu1 %80  ;;  %v87_v43 = vpop.permute.xlu0 %86 }
  0xc2   :  { %vm82_vm5 = vcmp.eq.s32.totalorder %v55_v32, %v81_v42  ;;  %vm88_vm6 = vcmp.eq.s32.totalorder %v55_v32, %v87_v43 }
  0xc3   :  { %v78_v45 = vadd.s32 %v77_v44, %v72_v41  ;;  %v83_v46 = vsel %vm82_vm5, 1, %v417_v1  ;;  %v89_v48 = vsel %vm88_vm6, 1, %v417_v1 }
  0xc5   :  { %v84_v47 = vadd.s32 %v83_v46, %v78_v45 }
  0xc6   :  { %v93_v49 = vpop.permute.xlu1 %92  ;;  %v105_v52 = vpop.permute.xlu0 %104 }
  0xc7   :  { %vm94_vm7 = vcmp.eq.s32.totalorder %v55_v32, %v93_v49  ;;  %v90_v50 = vadd.s32 %v89_v48, %v84_v47  ;;  %vm106_vm9 = vcmp.eq.s32.totalorder %v55_v32, %v105_v52 }
  0xc8   :  { %v95_v51 = vsel %vm94_vm7, 1, %v417_v1  ;;  %v107_v57 = vsel %vm106_vm9, 1, %v417_v1 }
  0xc9   :  { %v96_v54 = vadd.s32 %v95_v51, %v90_v50 }
  0xcb   :  { %v99_v53 = vpop.permute.xlu1 %98  ;;  %v123_v59 = vpop.permute.xlu0 %122 }
  0xcc   :  { %vm100_vm8 = vcmp.eq.s32.totalorder %v55_v32, %v99_v53  ;;  %vm124_vm11 = vcmp.eq.s32.totalorder %v55_v32, %v123_v59 }
  0xcd   :  { %v101_v55 = vsel %vm100_vm8, 1, %v417_v1  ;;  %v125_v2 = vsel %vm124_vm11, 1, %v417_v1 }
  0xce   :  { %v102_v56 = vadd.s32 %v101_v55, %v96_v54 }
  0xd0   :  { %v111_v58 = vpop.permute.xlu1 %110  ;;  %v108_v60 = vadd.s32 %v107_v57, %v102_v56 }
  0xd1   :  { %vm112_vm10 = vcmp.eq.s32.totalorder %v55_v32, %v111_v58 }
  0xd2   :  { %v113_v61 = vsel %vm112_vm10, 1, %v417_v1 }
  0xd3   :  { %v114_v63 = vadd.s32 %v113_v61, %v108_v60 }
  0xd5   :  { %v117_v62 = vpop.permute.xlu1 %116 }
  0xd6   :  { %vm118_vm12 = vcmp.eq.s32.totalorder %v55_v32, %v117_v62 }
  0xd7   :  { %v119_v0 = vsel %vm118_vm12, 1, %v417_v1 }
  0xd8   :  { %v120_v3 = vadd.s32 %v119_v0, %v114_v63 }
  0xda   :  { %v126_v4 = vadd.s32 %v125_v2, %v120_v3 }
  0xdc   :  { %v127_v6 = vcvt.s32.f32 %v126_v4 }
  0xde   :  { %v128_v7 = vadd.f32 %v127_v6, %v53_v5 }
  0xe0   :  { %267 = vmatmul.mubr.msk.f32.vlgmr.msra.gmra.mrb[0].mxu0 %vm140_vm13, %v128_v7 }
 0x1b3   :  { %v210_v8 = vpop.f32.mrb[0].mxu0 }
 0x1b4   :  { %214 = vst [vmem:[#allocation8] sm:$0xff] %v210_v8  ;;  %v268_v9 = vpop.f32.mrb[1].mxu0 }
 0x1b5   :  { %394 = shalt.err (!%p391_p0)
}
 0x1b6   :  { %s395_s25 = scalar_lea.hbm %s516_s3, 128 }
 0x1b7   :  { %p396_p1 = scmp.ne.s32.totalorder %s516_s3, %s395_s25  ;;  %p399_p2 = scmp.lt.u32.totalorder %s395_s25, %s516_s3 }
 0x1b9   :  { %p401_p3 = pnand %p399_p2, %p396_p1 }
 0x1bb   :  { %404 = shalt.err (!%p401_p3)
}
 0x1bc   :  { %224 = dma.vmem_to_hbm [thread:$0]  %s222_s21, 128, %s516_s3, [#allocation4]  }
 0x1bd   :  { %409 = dma.done.wait [#allocation4], 128  }
 0x1be   :  { %410 = vsyncadd [#allocation4], 4294967168 }
 0x1bf   :  { %228 = vsyncpa [#allocation3], 1 }
 0x1c0   :  { %229 = vsyncpa [#allocation6], 1 }
 0x1c1   :  { %230 = vsyncpa [#allocation4], 1 }

</bundles_post_ra>
